<compile_context>
chip_gen: v7x
topology: tpu7x:2x2x1
jax: 0.10.0
libtpu: 0.0.40
codegen_flags: <defaults>
</compile_context>

<pallas_src>
import functools
import math
from typing import NamedTuple

import jax
import jax.numpy as jnp
from jax.experimental import pallas as pl
from jax.experimental.pallas import tpu as pltpu


# ----------------------------------------------------------------------------
# Row-tiling helpers (byte-budgeted tiles, no explicit padding)
# ----------------------------------------------------------------------------
_VMEM_TILE_BUDGET = 24 * 1024 * 1024   # double-buffered tiled IO + intermediates
_MAX_TILE_ROWS = 8192                  # keeps Mosaic spill/scratch pressure sane
_VMEM_LIMIT_BYTES = 32 * 1024 * 1024   # <= v7x scoped default; well under 64 MiB physical


def _cdiv(a, b):
    return -(-a // b)


def _round_up(x, m):
    return _cdiv(x, m) * m


def _row_plan(nrows, io_row_bytes, interm_row_bytes):
    """Pick a row block size from a VMEM byte budget.

    io_row_bytes: bytes/row summed over all row-tiled inputs AND outputs (double-buffered).
    interm_row_bytes: rough bytes/row of in-kernel full-block intermediates (single copy).
    """
    nrows = max(int(nrows), 1)
    denom = 2 * max(int(io_row_bytes), 1) + max(int(interm_row_bytes), 0)
    br = _VMEM_TILE_BUDGET // denom
    br = max(8, min(br, _MAX_TILE_ROWS))
    br = (br // 8) * 8
    if br >= nrows:
        if nrows >= 64:
            # >= 2 grid blocks so the "parallel" axis actually shards across v7x's 2 TCs
            br = _round_up(_cdiv(nrows, 2), 8)
        else:
            br = nrows             # single full-extent block (no (8,128) constraint)
    return br


def _rowtiled_call(kernel, args, tiled, outs, nrows, interm_row_bytes=0):
    """Call `kernel` on a 1-D row grid.

    tiled[i]   => args[i] is (nrows, C) and row-tiled; otherwise (weights/biases) it is a
                  full resident VMEM block (constant index_map).
    outs       => list of (out_cols, out_dtype); multiple outputs supported.
    Ragged last block is handled by Pallas (per-row independence, masked stores).
    """
    io_row_bytes = 0
    for a, t in zip(args, tiled):
        if t:
            io_row_bytes += a.shape[1] * a.dtype.itemsize
    for cols, dt in outs:
        io_row_bytes += cols * jnp.dtype(dt).itemsize

    br = _row_plan(nrows, io_row_bytes, interm_row_bytes)
    grid = (pl.cdiv(nrows, br),)

    in_specs = []
    for a, t in zip(args, tiled):
        if t:
            in_specs.append(pl.BlockSpec((br, a.shape[1]), lambda i: (i, 0)))
        else:
            in_specs.append(pl.BlockSpec(a.shape, lambda i, nd=a.ndim: (0,) * nd))

    out_specs = tuple(pl.BlockSpec((br, cols), lambda i: (i, 0)) for cols, _ in outs)
    out_shape = tuple(jax.ShapeDtypeStruct((nrows, cols), dt) for cols, dt in outs)
    if len(outs) == 1:
        out_specs, out_shape = out_specs[0], out_shape[0]

    return pl.pallas_call(
        kernel,
        grid=grid,
        in_specs=in_specs,
        out_specs=out_specs,
        out_shape=out_shape,
        compiler_params=pltpu.CompilerParams(
            dimension_semantics=("parallel",),
            vmem_limit_bytes=_VMEM_LIMIT_BYTES),
    )(*args)


# ----------------------------------------------------------------------------
# Pallas kernels (row-tiled, f32 accumulation on the MXU, f32 LN statistics)
# ----------------------------------------------------------------------------
def _linear_kernel(x_ref, w_ref, b_ref, o_ref, *, relu):
    acc = jnp.dot(x_ref[...], w_ref[...], preferred_element_type=jnp.float32) + b_ref[...]
    if relu:
        acc = jnp.maximum(acc, 0.0)
    o_ref[...] = acc.astype(o_ref.dtype)


def pallas_linear(x, w, b, relu=False):
    return _rowtiled_call(
        functools.partial(_linear_kernel, relu=relu),
        [x, w, b.reshape(1, -1)], [True, False, False],
        [(w.shape[1], x.dtype)], x.shape[0],
        interm_row_bytes=4 * w.shape[1])


def _ln_stats(x, eps):
    mu = jnp.mean(x, axis=-1, keepdims=True)
    xc = x - mu
    var = jnp.mean(xc * xc, axis=-1, keepdims=True)
    return xc * jax.lax.rsqrt(var + eps)


def _ln_linear_kernel(x_ref, g_ref, bg_ref, w_ref, b_ref, o_ref, *, eps):
    # fused: LayerNorm(x) then Linear (output heads)
    xn = _ln_stats(x_ref[...].astype(jnp.float32), eps) * g_ref[...] + bg_ref[...]
    o = jnp.dot(xn.astype(w_ref.dtype), w_ref[...],
                preferred_element_type=jnp.float32) + b_ref[...]
    o_ref[...] = o.astype(o_ref.dtype)


def pallas_ln_linear(x, g, bg, w, b, eps=1e-5):
    return _rowtiled_call(
        functools.partial(_ln_linear_kernel, eps=eps),
        [x, g.reshape(1, -1), bg.reshape(1, -1), w, b.reshape(1, -1)],
        [True, False, False, False, False],
        [(w.shape[1], x.dtype)], x.shape[0],
        interm_row_bytes=4 * (2 * x.shape[1] + w.shape[1]))


def _res_ln_ffn_ln_kernel(x_ref, r_ref, g1_ref, b1_ref, w1_ref, bw1_ref,
                          w2_ref, bw2_ref, g2_ref, b2_ref, o_ref, *, eps):
    # fused: h = LN1(x + r); ff = relu(h@W1+b1)@W2+b2; out = LN2(h + ff)
    # the (rows, dim_ff) intermediate and h never touch HBM.
    x = (x_ref[...] + r_ref[...]).astype(jnp.float32)
    h = _ln_stats(x, eps) * g1_ref[...] + b1_ref[...]
    ff = jnp.dot(h.astype(w1_ref.dtype), w1_ref[...],
                 preferred_element_type=jnp.float32) + bw1_ref[...]
    ff = jnp.maximum(ff, 0.0)
    ff = jnp.dot(ff.astype(w2_ref.dtype), w2_ref[...],
                 preferred_element_type=jnp.float32) + bw2_ref[...]
    o = _ln_stats(h + ff, eps) * g2_ref[...] + b2_ref[...]
    o_ref[...] = o.astype(o_ref.dtype)


def pallas_res_ln_ffn_ln(x, r, ln1, lin1, lin2, ln2, eps=1e-5):
    d = x.shape[1]
    dff = lin1["w"].shape[1]
    return _rowtiled_call(
        functools.partial(_res_ln_ffn_ln_kernel, eps=eps),
        [x, r,
         ln1["g"].reshape(1, -1), ln1["b"].reshape(1, -1),
         lin1["w"], lin1["b"].reshape(1, -1),
         lin2["w"], lin2["b"].reshape(1, -1),
         ln2["g"].reshape(1, -1), ln2["b"].reshape(1, -1)],
        [True, True] + [False] * 8,
        [(d, x.dtype)], x.shape[0],
        interm_row_bytes=4 * (3 * d + dff))


def _edge_attn_film_kernel(q_ref, k_ref, e_ref, wma_ref, bma_ref, weo_ref, beo_ref,
                           mul_ref, add_ref, y_ref, ne_ref, *, scale, dx):
    # fused per-edge chain:
    #   [e_mul | e_add] = E @ [Wm|Wa] + [bm|ba]        (one MXU matmul, K = de)
    #   Y    = (q*k*scale) * (e_mul + 1) + e_add       -> attention logits (per feature)
    #   newE = FiLM(Y @ W_e_out + b_e_out, y_e_mul, y_e_add)
    # Y is produced once and re-used in-VMEM for the e_out projection (no HBM round trip).
    ma = jnp.dot(e_ref[...], wma_ref[...], preferred_element_type=jnp.float32) + bma_ref[...]
    e_mul, e_add = ma[:, :dx], ma[:, dx:]
    Y = (q_ref[...] * k_ref[...] * scale) * (e_mul + 1.0) + e_add
    y_ref[...] = Y.astype(y_ref.dtype)
    h = jnp.dot(Y.astype(weo_ref.dtype), weo_ref[...],
                preferred_element_type=jnp.float32) + beo_ref[...]
    ne_ref[...] = (add_ref[...] + (mul_ref[...] + 1.0) * h).astype(ne_ref.dtype)


def pallas_edge_attention_film(q_dst, k_src, E, wma, bma, weo, beo, ye_mul_e, ye_add_e, scale):
    M, dx = q_dst.shape
    de = E.shape[1]
    return _rowtiled_call(
        functools.partial(_edge_attn_film_kernel, scale=scale, dx=dx),
        [q_dst, k_src, E, wma, bma.reshape(1, -1), weo, beo.reshape(1, -1),
         ye_mul_e, ye_add_e],
        [True, True, True, False, False, False, False, True, True],
        [(dx, q_dst.dtype), (de, E.dtype)], M,
        interm_row_bytes=4 * (3 * dx + de))


def _linear_film_kernel(x_ref, w_ref, b_ref, m_ref, a_ref, o_ref):
    # fused: (x @ W + b) then FiLM:  add + (mul + 1) * h
    h = jnp.dot(x_ref[...], w_ref[...], preferred_element_type=jnp.float32) + b_ref[...]
    o_ref[...] = (a_ref[...] + (m_ref[...] + 1.0) * h).astype(o_ref.dtype)


def pallas_linear_film(x, w, b, mul, add):
    return _rowtiled_call(
        _linear_film_kernel,
        [x, w, b.reshape(1, -1), mul, add],
        [True, False, False, True, True],
        [(w.shape[1], x.dtype)], x.shape[0],
        interm_row_bytes=4 * w.shape[1])


# ----------------------------------------------------------------------------
# JAX glue: segment ops + tiny y-path math (graph-irregular / overhead-dominated)
# ----------------------------------------------------------------------------
# TODO(synk): segment softmax / scatter-add could become a Pallas kernel walking
#             contiguous dst segments via scalar-prefetched offsets; kept in plain
#             JAX here because the gather/scatter pattern has no clean BlockSpec form.
def segment_softmax(vals, seg, num_segments):
    m = jax.ops.segment_max(vals, seg, num_segments=num_segments)
    e = jnp.exp(vals - m[seg])
    s = jax.ops.segment_sum(e, seg, num_segments=num_segments)
    return e / (s[seg] + 1e-16)


def segment_mean(vals, seg, num_segments):
    s = jax.ops.segment_sum(vals, seg, num_segments=num_segments)
    c = jax.ops.segment_sum(jnp.ones((vals.shape[0], 1), vals.dtype), seg,
                            num_segments=num_segments)
    return s / jnp.maximum(c, 1.0)


def sort_edge_index(edge_index, edge_attr, num_nodes):
    key = edge_index[0] * num_nodes + edge_index[1]
    perm = jnp.argsort(key)
    return edge_index[:, perm], edge_attr[perm]


def _jnp_linear(x, p):
    return jnp.dot(x, p["w"]) + p["b"]


def _jnp_layernorm(x, g, b, eps=1e-5):
    x = x.astype(jnp.float32)
    mu = jnp.mean(x, -1, keepdims=True)
    xc = x - mu
    var = jnp.mean(xc * xc, -1, keepdims=True)
    return xc * jax.lax.rsqrt(var + eps) * g + b


# ----------------------------------------------------------------------------
# Parameter init (deterministic, PyTorch-style uniform(-1/sqrt(fan_in), +))
# ----------------------------------------------------------------------------
def _init_linear(key, fan_in, fan_out):
    kw, kb = jax.random.split(key)
    bound = 1.0 / math.sqrt(fan_in)
    return {
        "w": jax.random.uniform(kw, (fan_in, fan_out), jnp.float32, -bound, bound),
        "b": jax.random.uniform(kb, (fan_out,), jnp.float32, -bound, bound),
    }


def _init_ln(dim):
    return {"g": jnp.ones((dim,), jnp.float32), "b": jnp.zeros((dim,), jnp.float32)}


# ----------------------------------------------------------------------------
# TransformerConv (sparse node-edge-global attention)
# ----------------------------------------------------------------------------
def init_attn(key, dx, de, dy, last_layer):
    keys = jax.random.split(key, 16)
    q = _init_linear(keys[0], dx, dx)
    k = _init_linear(keys[1], dx, dx)
    v = _init_linear(keys[2], dx, dx)
    e_mul = _init_linear(keys[3], de, dx)
    e_add = _init_linear(keys[4], de, dx)
    y_e_mul = _init_linear(keys[5], dy, de)
    y_e_add = _init_linear(keys[6], dy, de)
    y_x_mul = _init_linear(keys[7], dy, dx)
    y_x_add = _init_linear(keys[8], dy, dx)
    p = {
        # batched projections: lane-denser outputs, fewer MXU pushes / kernel launches
        "qkv_w": jnp.concatenate([q["w"], k["w"], v["w"]], axis=1),
        "qkv_b": jnp.concatenate([q["b"], k["b"], v["b"]]),
        "yall_w": jnp.concatenate([y_e_mul["w"], y_e_add["w"], y_x_mul["w"], y_x_add["w"]], axis=1),
        "yall_b": jnp.concatenate([y_e_mul["b"], y_e_add["b"], y_x_mul["b"], y_x_add["b"]]),
        "e_ma_w": jnp.concatenate([e_mul["w"], e_add["w"]], axis=1),   # (de, 2dx)
        "e_ma_b": jnp.concatenate([e_mul["b"], e_add["b"]]),
        "x_out": _init_linear(keys[9], dx, dx),
        "e_out": _init_linear(keys[10], dx, de),
        "last_layer": last_layer,
    }
    if last_layer:
        y_y = _init_linear(keys[11], dy, dy)
        x_y = _init_linear(keys[12], dx, dy)
        e_y = _init_linear(keys[13], de, dy)
        # single concat-K matmul for the global update: [y|x_pool|e_pool] @ [Wyy;Wxy;Wey]
        p["yxe_w"] = jnp.concatenate([y_y["w"], x_y["w"], e_y["w"]], axis=0)
        p["yxe_b"] = y_y["b"] + x_y["b"] + e_y["b"]
        p["y_out"] = _init_linear(keys[14], dy, dy)
    return p


def transformer_conv(p, X, edge_index, E, y, batch, num_graphs, n_head):
    N, dx = X.shape
    M, de = E.shape
    df = dx // n_head
    src, dst = edge_index[0], edge_index[1]

    # single fused QKV projection (N, 3dx), split with plain XLA slicing
    qkv = pallas_linear(X, p["qkv_w"], p["qkv_b"])
    Q, K, V = qkv[:, :dx], qkv[:, dx:2 * dx], qkv[:, 2 * dx:]

    # y is (num_graphs, dy): tens of rows -> plain jnp (XLA fuses; no launch/pad overhead)
    yproj = jnp.dot(y, p["yall_w"]) + p["yall_b"]
    ye_mul, ye_add = yproj[:, :de], yproj[:, de:2 * de]
    yx_mul, yx_add = yproj[:, 2 * de:2 * de + dx], yproj[:, 2 * de + dx:]

    # TODO(synk): these per-edge gathers still materialize three (M, dx) arrays in HBM;
    #             an in-kernel gather from a resident (N, 3dx) QKV VMEM block would remove
    #             them, but sublane dynamic-gather lowering is not yet robust enough.
    q_dst = jnp.take(Q, dst, axis=0)
    k_src = jnp.take(K, src, axis=0)
    v_src = jnp.take(V, src, axis=0)

    edge_batch = jnp.take(batch, src, axis=0)
    # fused: attention logits Y (with single concat e_mul|e_add projection) AND
    #        newE = FiLM(Y @ W_e_out + b, ye_mul[batch_e], ye_add[batch_e]) in one kernel.
    Y, newE = pallas_edge_attention_film(
        q_dst, k_src, E,
        p["e_ma_w"], p["e_ma_b"],
        p["e_out"]["w"], p["e_out"]["b"],
        jnp.take(ye_mul, edge_batch, axis=0),
        jnp.take(ye_add, edge_batch, axis=0),
        1.0 / math.sqrt(df))

    # per-feature segment softmax over incoming edges + scatter-add aggregation (plain JAX)
    attn = segment_softmax(Y.reshape(M, n_head, df), dst, N)
    weighted = attn * v_src.reshape(M, n_head, df)
    aggX = jax.ops.segment_sum(weighted, dst, num_segments=N).reshape(N, dx)

    # fused: newX = FiLM(aggX @ W_x_out + b,  yx_mul[batch], yx_add[batch])
    newX = pallas_linear_film(aggX, p["x_out"]["w"], p["x_out"]["b"],
                              jnp.take(yx_mul, batch, axis=0),
                              jnp.take(yx_add, batch, axis=0))

    if p["last_layer"]:
        x_pool = segment_mean(newX, batch, num_graphs)
        e_pool = segment_mean(newE, edge_batch, num_graphs)
        h = jnp.dot(jnp.concatenate([y, x_pool, e_pool], axis=1), p["yxe_w"]) + p["yxe_b"]
        new_y = jnp.dot(h, p["y_out"]["w"]) + p["y_out"]["b"]
    else:
        new_y = y
    return newX, newE, new_y


# ----------------------------------------------------------------------------
# XEyTransformerLayer
# ----------------------------------------------------------------------------
def init_xey_layer(key, dx, de, dy, dim_ffX, dim_ffE, dim_ffy, last_layer):
    keys = jax.random.split(key, 8)
    p = {
        "attn": init_attn(keys[0], dx, de, dy, last_layer),
        "linX1": _init_linear(keys[1], dx, dim_ffX),
        "linX2": _init_linear(keys[2], dim_ffX, dx),
        "normX1": _init_ln(dx), "normX2": _init_ln(dx),
        "linE1": _init_linear(keys[3], de, dim_ffE),
        "linE2": _init_linear(keys[4], dim_ffE, de),
        "normE1": _init_ln(de), "normE2": _init_ln(de),
        "last_layer": last_layer,
    }
    if last_layer:
        p["lin_y1"] = _init_linear(keys[5], dy, dim_ffy)
        p["lin_y2"] = _init_linear(keys[6], dim_ffy, dy)
        p["norm_y1"] = _init_ln(dy)
        p["norm_y2"] = _init_ln(dy)
    return p


def xey_layer(p, X, edge_index, E, y, batch, num_graphs, n_head, eps=1e-5):
    newX, newE, new_y = transformer_conv(p["attn"], X, edge_index, E, y, batch,
                                         num_graphs, n_head)
    # fused residual-LN -> FFN -> residual-LN per tensor: one kernel, no HBM round trips
    X = pallas_res_ln_ffn_ln(X, newX, p["normX1"], p["linX1"], p["linX2"], p["normX2"], eps)
    E = pallas_res_ln_ffn_ln(E, newE, p["normE1"], p["linE1"], p["linE2"], p["normE2"], eps)

    if p["last_layer"]:
        # tiny y path: plain jnp (dropout = identity in eval mode)
        y = _jnp_layernorm(y + new_y, p["norm_y1"]["g"], p["norm_y1"]["b"], eps)
        ffy = _jnp_linear(jax.nn.relu(_jnp_linear(y, p["lin_y1"])), p["lin_y2"])
        y = _jnp_layernorm(y + ffy, p["norm_y2"]["g"], p["norm_y2"]["b"], eps)
    else:
        y = new_y
    return X, E, y


# ----------------------------------------------------------------------------
# GraphTransformerConv
# ----------------------------------------------------------------------------
class Dims(NamedTuple):
    X: int
    E: int
    y: int
    charge: int


def init_graph_transformer(key, n_layers, in_dims, hidden, out_dims, sn_hidden_dim,
                           output_y, dim_ffy=2048):
    keys = jax.random.split(key, n_layers + 8)
    p = {
        "lin_in_X": _init_linear(keys[0], in_dims.X + in_dims.charge + sn_hidden_dim,
                                 hidden["dx"]),
        "lin_in_E": _init_linear(keys[1], in_dims.E, hidden["de"]),
        "lin_in_y": _init_linear(keys[2], in_dims.y, hidden["dy"]),
        "layers": [
            init_xey_layer(keys[3 + i], hidden["dx"], hidden["de"], hidden["dy"],
                           hidden["dim_ffX"], hidden["dim_ffE"], dim_ffy,
                           last_layer=(True if output_y else i < n_layers - 1))
            for i in range(n_layers)
        ],
        "out_ln_X": _init_ln(hidden["dx"]),
        "out_ln_E": _init_ln(hidden["de"]),
        "lin_out_X": _init_linear(keys[3 + n_layers], hidden["dx"],
                                  out_dims.X + out_dims.charge),
        "lin_out_E": _init_linear(keys[4 + n_layers], hidden["de"], out_dims.E),
        "output_y": output_y,
    }
    if output_y:
        p["out_ln_y"] = _init_ln(hidden["dy"])
        p["lin_out_y"] = _init_linear(keys[5 + n_layers], hidden["dy"], out_dims.y)
    return p


def graph_transformer_forward(p, config, X, edge_attr, edge_index, y, batch):
    # NOTE: like the original (PyG convention), the final edge residual assumes the
    #       incoming edge_index/edge_attr are already canonically (row-major) sorted.
    N = X.shape[0]
    X0, E0, y0 = X, edge_attr, y

    X = pallas_linear(X, p["lin_in_X"]["w"], p["lin_in_X"]["b"])
    E = pallas_linear(edge_attr, p["lin_in_E"]["w"], p["lin_in_E"]["b"])
    y = _jnp_linear(y, p["lin_in_y"])          # tiny: plain jnp

    for lp in p["layers"]:
        X, E, y = xey_layer(lp, X, edge_index, E, y, batch,
                            config["num_graphs"], config["n_head"])

    # fused LayerNorm + output Linear heads
    X = pallas_ln_linear(X, p["out_ln_X"]["g"], p["out_ln_X"]["b"],
                         p["lin_out_X"]["w"], p["lin_out_X"]["b"])
    E = pallas_ln_linear(E, p["out_ln_E"]["g"], p["out_ln_E"]["b"],
                         p["lin_out_E"]["w"], p["lin_out_E"]["b"])
    if p["output_y"]:
        y = _jnp_linear(_jnp_layernorm(y, p["out_ln_y"]["g"], p["out_ln_y"]["b"]),
                        p["lin_out_y"])

    top_edge_index, top_edge_attr = sort_edge_index(edge_index, E, N)
    _, bot_edge_attr = sort_edge_index(edge_index[jnp.array([1, 0])], E, N)

    odX, odC = config["out_X"], config["out_charge"]
    odE, ody = config["out_E"], config["out_y"]
    charges = X[:, odX:odX + odC] + X0[:, odX:odX + odC]
    Xout = X[:, :odX] + X0[:, :odX]
    Eout = top_edge_attr + bot_edge_attr + E0[:, :odE]
    if p["output_y"]:
        y = y + y0[:, :ody]
    return dict(node=Xout, edge_attr=Eout, edge_index=top_edge_index, y=y,
                batch=batch, charge=charges)


# ----------------------------------------------------------------------------
if __name__ == "__main__":
    key = jax.random.PRNGKey(0)
    in_dims = Dims(X=8, E=4, y=12, charge=2)
    out_dims = Dims(X=8, E=4, y=12, charge=2)
    sn_hidden_dim = 4
    hidden = dict(dx=32, de=16, dy=32, n_head=4, dim_ffX=64, dim_ffE=32)
    n_layers = 2
    output_y = True

    kparams, kx, ke, ky = jax.random.split(key, 4)
    params = init_graph_transformer(kparams, n_layers, in_dims, hidden, out_dims,
                                    sn_hidden_dim, output_y, dim_ffy=64)

    # 2 graphs of 8 nodes each, ring edges stored in both directions (symmetric)
    nodes_per_graph, num_graphs = 8, 2
    N = nodes_per_graph * num_graphs
    src_list, dst_list = [], []
    for g in range(num_graphs):
        off = g * nodes_per_graph
        for i in range(nodes_per_graph):
            j = (i + 1) % nodes_per_graph
            src_list += [off + i, off + j]
            dst_list += [off + j, off + i]
    edge_index = jnp.array([src_list, dst_list], dtype=jnp.int32)
    M = edge_index.shape[1]
    edge_attr = jax.random.normal(ke, (M, in_dims.E), jnp.float32)
    # canonical (row-major) edge ordering, as PyG preprocessing produces
    edge_index, edge_attr = sort_edge_index(edge_index, edge_attr, N)
    batch = jnp.repeat(jnp.arange(num_graphs, dtype=jnp.int32), nodes_per_graph)

    X = jax.random.normal(kx, (N, in_dims.X + in_dims.charge + sn_hidden_dim), jnp.float32)
    y = jax.random.normal(ky, (num_graphs, in_dims.y), jnp.float32)

    config = dict(num_graphs=num_graphs, n_head=hidden["n_head"],
                  out_X=out_dims.X, out_E=out_dims.E,
                  out_y=out_dims.y, out_charge=out_dims.charge)

    out = graph_transformer_forward(params, config, X, edge_attr, edge_index, y, batch)
    jax.block_until_ready(out)

    assert out["node"].shape == (N, out_dims.X)
    assert out["charge"].shape == (N, out_dims.charge)
    assert out["edge_attr"].shape == (M, out_dims.E)
    assert out["y"].shape == (num_graphs, out_dims.y)
    assert all(jnp.all(jnp.isfinite(v)) for k, v in out.items()
               if k in ("node", "edge_attr", "y", "charge"))
    print("KERNEL_OK")
</pallas_src>

<mosaic_0001>
module attributes {stable_mosaic.version = 11 : i64} {
  func.func @_linear_kernel(%arg0: i32, %arg1: memref<16x14xf32, #tpu.memory_space<vmem>>, %arg2: memref<14x32xf32, #tpu.memory_space<vmem>>, %arg3: memref<1x32xf32, #tpu.memory_space<vmem>>, %arg4: memref<16x32xf32, #tpu.memory_space<vmem>>) attributes {dimension_semantics = [#tpu.dimension_semantics<parallel>], iteration_bounds = array<i64: 1>, scalar_prefetch = 0 : i64, scratch_operands = 0 : i64, tpu.core_type = #tpu.core_type<tc>, window_params = [{transform_indices = @transform_0, window_bounds = array<i64: 16, 14>}, {pipeline_mode = #tpu.pipeline_mode<synchronous>, transform_indices = @transform_1, window_bounds = array<i64: 14, 32>}, {pipeline_mode = #tpu.pipeline_mode<synchronous>, transform_indices = @transform_2, window_bounds = array<i64: 1, 32>}, {transform_indices = @transform_3, window_bounds = array<i64: 16, 32>}]} {
    %c0 = arith.constant 0 : index
    %c0_0 = arith.constant 0 : index
    %0 = vector.load %arg1[%c0, %c0_0] : memref<16x14xf32, #tpu.memory_space<vmem>>, vector<16x14xf32>
    %c0_1 = arith.constant 0 : index
    %c0_2 = arith.constant 0 : index
    %1 = vector.load %arg2[%c0_1, %c0_2] : memref<14x32xf32, #tpu.memory_space<vmem>>, vector<14x32xf32>
    %cst = arith.constant dense<0.000000e+00> : vector<16x32xf32>
    %2 = tpu.matmul %0, %1, %cst {dimension_numbers = #tpu.dot_dimension_numbers<[1], [0], [0], [1], [0, 0, 1, 1], [], []>} : vector<16x14xf32>, vector<14x32xf32>, vector<16x32xf32> -> vector<16x32xf32>
    %c0_3 = arith.constant 0 : index
    %c0_4 = arith.constant 0 : index
    %3 = vector.load %arg3[%c0_3, %c0_4] : memref<1x32xf32, #tpu.memory_space<vmem>>, vector<1x32xf32>
    %4 = vector.broadcast %3 : vector<1x32xf32> to vector<16x32xf32>
    %5 = arith.addf %2, %4 : vector<16x32xf32>
    %c0_5 = arith.constant 0 : index
    %c0_6 = arith.constant 0 : index
    %6 = vector.load %arg4[%c0_5, %c0_6] : memref<16x32xf32, #tpu.memory_space<vmem>>, vector<16x32xf32>
    tpu.vector_store %arg4[%c0_5, %c0_6], %5 {strides = array<i32>} : memref<16x32xf32, #tpu.memory_space<vmem>>, vector<16x32xf32>,
    return
  }
  func.func @transform_0(%arg0: i32) -> (i32, i32) {
    %c0_i32 = arith.constant 0 : i32
    %c0_i32_0 = arith.constant 0 : i32
    return %arg0, %c0_i32 : i32, i32
  }
  func.func @transform_1(%arg0: i32) -> (i32, i32) {
    %c0_i32 = arith.constant 0 : i32
    %c0_i32_0 = arith.constant 0 : i32
    %c0_i32_1 = arith.constant 0 : i32
    return %c0_i32, %c0_i32_0 : i32, i32
  }
  func.func @transform_2(%arg0: i32) -> (i32, i32) {
    %c0_i32 = arith.constant 0 : i32
    %c0_i32_0 = arith.constant 0 : i32
    %c0_i32_1 = arith.constant 0 : i32
    return %c0_i32, %c0_i32_0 : i32, i32
  }
  func.func @transform_3(%arg0: i32) -> (i32, i32) {
    %c0_i32 = arith.constant 0 : i32
    %c0_i32_0 = arith.constant 0 : i32
    return %arg0, %c0_i32 : i32, i32
  }
}

</mosaic_0001>

<bundles_post_ra>
// kernel: tpu_custom_call.1
= control target key start
LH: loop header
LB: loop body
LE: loop exit
PB: predicated region body
PF: predicated region fallthrough
CT: control target
= control target key end

     0   :  { %8 = vsyncpa [#allocation3], 0  ;;  %s334_s0 = inlined_call_operand.hbm [shape: f32[16,14], index: 0, kind: input, shape index: {}]   ;;  %s335_s1 = inlined_call_operand.hbm [shape: f32[14,32], index: 1, kind: input, shape index: {}]   ;;  %s336_s2 = inlined_call_operand.vmem [shape: f32[1,32], index: 2, kind: input, shape index: {}]   ;;  %s337_s3 = inlined_call_operand.hbm [shape: f32[16,32], index: 3, kind: output, shape index: {}]  }
   0x1   :  { %9 = vsyncpa [#allocation6], 0 }
   0x2   :  { %10 = vsyncpa [#allocation4], 0  ;;  %s260_s12 = smov [#allocation2]   ;;  %s188_s16 = scalar_lea.hbm %s334_s0, 256 }
   0x3   :  { %s16_s13 = sshll.u32 %s260_s12, 4  ;;  %p189_p0 = scmp.ne.s32.totalorder %s334_s0, %s188_s16  ;;  %s17_s13 = int_to_ptr.vmem [resolvable:$true] %s16_s13 }
   0x4   :  { %p192_p1 = scmp.lt.u32.totalorder %s188_s16, %s334_s0 }
   0x6   :  { %p194_p2 = pnand %p192_p1, %p189_p0 }
   0x8   :  { %197 = shalt.err (!%p194_p2)
}
   0x9   :  { %s198_s21 = scalar_lea.vmem %s17_s13, 256  ;;  %p203_p4 = scmp.lt.s32.totalorder %s17_s13, %s17_s13 }
   0xa   :  { %p199_p3 = scmp.ne.s32.totalorder %s17_s13, %s198_s21  ;;  %p204_p5 = scmp.lt.s32.totalorder %s198_s21, %s198_s21 }
   0xc   :  { %p205_p6 = por %p204_p5, %p203_p4 }
   0xe   :  { %p206_p7 = pnand %p205_p6, %p199_p3 }
  0x10   :  { %209 = shalt.err (!%p206_p7)
}
  0x11   :  { %s261_s22 = smov 128   ;;  %s262_s23 = smov 8  }
  0x12   :  { %22 = dma.hbm_to_vmem [thread:$0]  %s334_s0, 256, %s17_s13, [#allocation3], %s261_s22, %s261_s22, %s262_s23  }
  0x13   :  { %s263_s26 = smov [#allocation5]   ;;  %s210_s30 = scalar_lea.hbm %s335_s1, 256 }
  0x14   :  { %s28_s27 = sshll.u32 %s263_s26, 4  ;;  %p211_p8 = scmp.ne.s32.totalorder %s335_s1, %s210_s30  ;;  %s29_s27 = int_to_ptr.vmem [resolvable:$true] %s28_s27 }
  0x15   :  { %p214_p9 = scmp.lt.u32.totalorder %s210_s30, %s335_s1 }
  0x17   :  { %p216_p10 = pnand %p214_p9, %p211_p8 }
  0x19   :  { %219 = shalt.err (!%p216_p10)
}
  0x1a   :  { %s220_s8 = scalar_lea.vmem %s29_s27, 256  ;;  %p225_p12 = scmp.lt.s32.totalorder %s29_s27, %s29_s27 }
  0x1b   :  { %p221_p11 = scmp.ne.s32.totalorder %s29_s27, %s220_s8  ;;  %p226_p13 = scmp.lt.s32.totalorder %s220_s8, %s220_s8 }
  0x1d   :  { %p227_p0 = por %p226_p13, %p225_p12 }
  0x1f   :  { %p228_p1 = pnand %p227_p0, %p221_p11 }
  0x21   :  { %231 = shalt.err (!%p228_p1)
}
  0x22   :  { %34 = dma.hbm_to_vmem [thread:$0]  %s335_s1, 256, %s29_s27, [#allocation6], %s261_s22, %s261_s22, %s262_s23  }
  0x23   :  { %254 = dma.done.wait [#allocation3], 256  }
  0x24   :  { %255 = vsyncadd [#allocation3], 4294967040 }
  0x25   :  { %256 = dma.done.wait [#allocation6], 256  }
  0x26   :  { %257 = vsyncadd [#allocation6], 4294967040  ;;  %vm61_vm0 = vcmask 1045504   ;;  %vm54_vm1 = vcmask 113664   ;;  %vm264_vm2 = vmmov 1   ;;  %v45_v0 = vld [vmem:[#allocation5] sm:$0xff] }
  0x27   :  { %vm177_vm3 = vmpackc.low %vm61_vm0, %vm264_vm2  ;;  %v46_v1 = vld [vmem:[#allocation5 + $0x8] sm:$0x3f]  ;;  %v43_v2 = vld [vmem:[#allocation2] sm:$0xff]  ;;  %s265_s1 = smov [#allocation7]   ;;  %vm140_vm4 = vcmask 261120  }
  0x28   :  { %v176_v3 = vpack.c.bf16 %v46_v1, %v45_v0  ;;  %173 = vmatprep.mubr.msk.f32.mxu0 %vm54_vm1, %v43_v2  ;;  %v44_v4 = vld [vmem:[#allocation2 + $0x8] sm:$0xff]  ;;  %v161_v5 = vld [vmem:[%s336_s2] ss:$0 sm:$0xff]  ;;  %s148_s12 = sshll.u32 %s265_s1, 4  ;;  %s149_s12 = int_to_ptr.vmem [resolvable:$true] %s148_s12 }
  0x29   :  { %s232_s13 = scalar_lea.vmem %s149_s12, 256  ;;  %p237_p3 = scmp.lt.s32.totalorder %s149_s12, %s149_s12 }
  0x2a   :  { %178 = vmatprep.subr.msk.bf16.mxu0 %vm177_vm3, %v176_v3  ;;  %p233_p2 = scmp.ne.s32.totalorder %s149_s12, %s232_s13  ;;  %p238_p4 = scmp.lt.s32.totalorder %s232_s13, %s232_s13 }
  0x2b   :  { %181 = vmatpush3.bf16.msk.msra.mxu0 %vm177_vm3, %v176_v3 }
  0x2c   :  { %p239_p5 = por %p238_p4, %p237_p3 }
  0x2e   :  { %174 = vmatmul.mubr.msk.f32.vlgmr.msra.gmra.mrb[0].mxu0 %vm54_vm1, %v44_v4  ;;  %p240_p6 = pnand %p239_p5, %p233_p2 }
 0x101   :  { %v175_v6 = vpop.f32.mrb[0].mxu0 }
 0x102   :  { %v137_v7 = vadd.f32 %v175_v6, %v161_v5  ;;  %v131_v8 = vpop.f32.mrb[1].mxu0 }
 0x103   :  { %v132_v9 = vadd.f32 %v161_v5, %v131_v8 }
 0x104   :  { %142 = vst.msk [vmem:[#allocation7 + $0x8] sm:$0xff] %vm140_vm4, %v137_v7 }
 0x105   :  { %141 = vst.msk [vmem:[#allocation7] sm:$0xff] %vm140_vm4, %v132_v9 }
 0x106   :  { %243 = shalt.err (!%p240_p6)
}
 0x107   :  { %s244_s2 = scalar_lea.hbm %s337_s3, 256 }
 0x108   :  { %p245_p7 = scmp.ne.s32.totalorder %s337_s3, %s244_s2  ;;  %p248_p8 = scmp.lt.u32.totalorder %s244_s2, %s337_s3 }
 0x10a   :  { %p250_p9 = pnand %p248_p8, %p245_p7 }
 0x10c   :  { %253 = shalt.err (!%p250_p9)
}
 0x10d   :  { %154 = dma.vmem_to_hbm [thread:$0]  %s149_s12, 256, %s337_s3, [#allocation4], %s261_s22, %s261_s22, %s262_s23  }
 0x10e   :  { %258 = dma.done.wait [#allocation4], 256  }
 0x10f   :  { %259 = vsyncadd [#allocation4], 4294967040 }
 0x110   :  { %158 = vsyncpa [#allocation3], 1 }
 0x111   :  { %159 = vsyncpa [#allocation6], 1 }
 0x112   :  { %160 = vsyncpa [#allocation4], 1 }

</bundles_post_ra>
